<compile_context>
chip_gen: v7x
topology: tpu7x:2x2x1
jax: 0.10.0
libtpu: 0.0.40
codegen_flags: <defaults>
</compile_context>

<pallas_src>
import math
import jax
import jax.numpy as jnp
from jax.experimental import pallas as pl
from jax.experimental.pallas import tpu as pltpu


def _round_up(x, m):
    return ((x + m - 1) // m) * m


def _cdiv(a, b):
    return (a + b - 1) // b


def _vmem_capacity_bytes():
    """Physical VMEM per TensorCore (generation-aware); conservative fallback."""
    try:
        return int(pltpu.get_tpu_info().vmem_capacity_bytes)
    except Exception:
        return 64 << 20  # assume the smallest current generation (v7x) if query fails


# ------------------------------- kernels ----------------------------------- #

def adapter_kernel(x_ref, w1_ref, w2_ref, o_ref):
    """Fused y = relu(relu(x @ W1) @ W2); both weights fully VMEM-resident."""
    x = x_ref[...]
    h = jnp.dot(x, w1_ref[...], preferred_element_type=jnp.float32)
    h = jnp.maximum(h, 0.0)                                      # ReLU #1 (f32)
    y = jnp.dot(h.astype(w2_ref.dtype), w2_ref[...],
                preferred_element_type=jnp.float32)
    o_ref[...] = jnp.maximum(y, 0.0).astype(o_ref.dtype)         # ReLU #2


def adapter_kernel_wtiled(x_ref, w1_ref, w2_ref, o_ref, h_ref):
    """Same math, but W2 / out are tiled along the output-channel axis.

    The (TB, Hp) hidden activation is computed once per batch tile (at the
    first output-channel grid step) into a VMEM scratch and reused for every
    W2 column tile, so W2 streams through VMEM instead of being resident.
    """
    @pl.when(pl.program_id(1) == 0)
    def _():
        h = jnp.dot(x_ref[...], w1_ref[...], preferred_element_type=jnp.float32)
        h_ref[...] = jnp.maximum(h, 0.0).astype(h_ref.dtype)

    y = jnp.dot(h_ref[...], w2_ref[...], preferred_element_type=jnp.float32)
    o_ref[...] = jnp.maximum(y, 0.0).astype(o_ref.dtype)


# ---------------------------- sizing helpers -------------------------------- #

def _choose_block_b(B, Cp, comp_itemsize):
    # Size the x tile for >= ~1 MiB of DMA per grid step (HBM-bound regime),
    # between 256 and 2048 rows; the MXU handles M > 256 in multiple passes.
    target_rows = (1 << 20) // max(Cp * comp_itemsize, 1)
    tb = max(256, min(2048, _round_up(max(target_rows, 8), 8)))
    tb = min(tb, _round_up(B, 8))
    # Keep >= 2 grid steps so dimension_semantics=("parallel",) can shard the
    # batch across both v7x TensorCores (harmless on single-TC v5e/v6e).
    if B > 8 and _round_up(B, tb) // tb < 2:
        tb = min(tb, max(8, _round_up(_cdiv(B, 2), 8)))
    # Prefer a tile that divides B so the big activation tensors never get
    # padded/sliced in HBM (accept only if it costs < 2x tile shrink).
    if B % 8 == 0 and B % tb != 0:
        for cand in range(tb, 7, -8):
            if B % cand == 0:
                if cand * 2 >= tb:
                    tb = cand
                break
    return tb


def _vmem_bytes_resident(tb, Cp, Hp, comp_it, out_it, w_bufs):
    return (2 * tb * Cp * comp_it          # x tile (double-buffered)
            + 2 * tb * Cp * out_it         # out tile (double-buffered, out dtype)
            + w_bufs * Cp * Hp * comp_it   # W1
            + w_bufs * Hp * Cp * comp_it   # W2
            + tb * Hp * 4                  # f32 hidden intermediate
            + tb * Cp * 4)                 # f32 pre-cast output intermediate


def _vmem_bytes_wtiled(tb, Cp, Hp, tco, comp_it, out_it, w1_bufs):
    return (2 * tb * Cp * comp_it          # x tile
            + 2 * tb * tco * out_it        # out tile
            + w1_bufs * Cp * Hp * comp_it  # W1 resident
            + 2 * Hp * tco * comp_it       # W2 column tile (double-buffered)
            + tb * Hp * comp_it            # hidden VMEM scratch
            + tb * Hp * 4                  # f32 hidden intermediate
            + tb * tco * 4)                # f32 pre-cast output intermediate


# -------------------------------- wrapper ----------------------------------- #

def adapter_forward(x, w1_t, w2_t, *, compute_dtype=None, block_b=None,
                    weight_tiling=None):
    """y = ReLU(ReLU(x @ W1^T) @ W2^T)  (PyTorch Adapter forward).

    x:    (..., C)   any number of leading dims (flattened to one batch axis).
    w1_t: (C, H),  w2_t: (H, C)   weights pre-transposed to (in, out).
    compute_dtype: MXU operand dtype. Defaults to bfloat16 when x is float32
      (accumulation and ReLU'd intermediates stay f32; output keeps x's dtype).
      Pass jnp.float32 for full-precision operands.
    weight_tiling: None = auto (stream W2 in output-channel tiles only when the
      resident weights would not fit VMEM, e.g. large C in f32 on v7x);
      True/False to force.
    """
    orig_shape = x.shape
    orig_dtype = x.dtype
    C = orig_shape[-1]
    H = w1_t.shape[1]
    assert w1_t.shape == (C, H) and w2_t.shape == (H, C)

    if compute_dtype is None:
        compute_dtype = jnp.bfloat16 if orig_dtype == jnp.float32 else orig_dtype
    comp_it = jnp.dtype(compute_dtype).itemsize
    out_it = jnp.dtype(orig_dtype).itemsize

    # Flatten leading dims to one batch axis (cheap metadata reshape).
    x2 = x.reshape(-1, C)
    B = x2.shape[0]

    # Lane-dense channel padding (exact: padded hidden units are 0 after ReLU,
    # padded output columns are sliced off).
    Cp = _round_up(C, 128)
    Hp = _round_up(H, 128)

    tb = block_b if block_b is not None else _choose_block_b(B, Cp, comp_it)
    tb = max(8, _round_up(min(tb, _round_up(B, 8)), 8))

    vmem_cap = _vmem_capacity_bytes()
    usable = max(24 << 20, int(vmem_cap * 0.85))  # ~54 MiB v7x, ~108 MiB v5e/v6e

    use_wtiling = weight_tiling
    if use_wtiling is None:
        use_wtiling = _vmem_bytes_resident(tb, Cp, Hp, comp_it, out_it, 1) > usable

    tco = Cp
    if use_wtiling:
        tco = min(Cp, 512)
        while Cp % tco != 0:
            tco -= 128
        while (_vmem_bytes_wtiled(tb, Cp, Hp, tco, comp_it, out_it, 1) > usable
               and tco > 128):
            tco -= 128
            while Cp % tco != 0 and tco > 128:
                tco -= 128
        while (_vmem_bytes_wtiled(tb, Cp, Hp, tco, comp_it, out_it, 1) > usable
               and tb > 8):
            tb = max(8, _round_up(tb // 2, 8))
    else:
        while (_vmem_bytes_resident(tb, Cp, Hp, comp_it, out_it, 1) > usable
               and tb > 8):
            tb = max(8, _round_up(tb // 2, 8))
    Bp = _round_up(B, tb)

    # Cast MXU operands; pad only what actually needs padding (activation pads
    # are full HBM copies, so they are skipped when shapes are already aligned).
    x2 = x2.astype(compute_dtype)
    w1c = w1_t.astype(compute_dtype)
    w2c = w2_t.astype(compute_dtype)

    pad_b, pad_c, pad_h = Bp - B, Cp - C, Hp - H
    xp = jnp.pad(x2, ((0, pad_b), (0, pad_c))) if (pad_b or pad_c) else x2
    w1p = jnp.pad(w1c, ((0, pad_c), (0, pad_h))) if (pad_c or pad_h) else w1c
    w2p = jnp.pad(w2c, ((0, pad_h), (0, pad_c))) if (pad_h or pad_c) else w2c

    def _wspec(shape, index_map, single):
        if single:
            return pl.BlockSpec(shape, index_map, pipeline_mode=pl.Buffered(1))
        return pl.BlockSpec(shape, index_map)

    def _run(single_buffer_weights):
        w_bufs = 1 if single_buffer_weights else 2
        if not use_wtiling:
            budget = _vmem_bytes_resident(tb, Cp, Hp, comp_it, out_it, w_bufs)
            grid_spec = pltpu.PrefetchScalarGridSpec(
                num_scalar_prefetch=0,
                grid=(Bp // tb,),
                in_specs=[
                    pl.BlockSpec((tb, Cp), lambda i: (i, 0)),         # x tile
                    _wspec((Cp, Hp), lambda i: (0, 0),
                           single_buffer_weights),                    # W1 resident
                    _wspec((Hp, Cp), lambda i: (0, 0),
                           single_buffer_weights),                    # W2 resident
                ],
                out_specs=pl.BlockSpec((tb, Cp), lambda i: (i, 0)),
            )
            dims = ("parallel",)
            kernel = adapter_kernel
        else:
            budget = _vmem_bytes_wtiled(tb, Cp, Hp, tco, comp_it, out_it, w_bufs)
            grid_spec = pltpu.PrefetchScalarGridSpec(
                num_scalar_prefetch=0,
                grid=(Bp // tb, Cp // tco),
                in_specs=[
                    pl.BlockSpec((tb, Cp), lambda i, j: (i, 0)),      # x tile
                    _wspec((Cp, Hp), lambda i, j: (0, 0),
                           single_buffer_weights),                    # W1 resident
                    pl.BlockSpec((Hp, tco), lambda i, j: (0, j)),     # W2 col tile
                ],
                out_specs=pl.BlockSpec((tb, tco), lambda i, j: (i, j)),
                scratch_shapes=[pltpu.VMEM((tb, Hp), compute_dtype)],
            )
            dims = ("parallel", "arbitrary")
            kernel = adapter_kernel_wtiled

        vmem_limit = int(min(usable,
                             max(budget + budget // 4 + (2 << 20), 16 << 20)))
        return pl.pallas_call(
            kernel,
            out_shape=jax.ShapeDtypeStruct((Bp, Cp), orig_dtype),
            grid_spec=grid_spec,
            compiler_params=pltpu.CompilerParams(
                dimension_semantics=dims,
                vmem_limit_bytes=vmem_limit,
            ),
        )(xp, w1p, w2p)

    try:
        out = _run(single_buffer_weights=True)
    except Exception:
        # Safety net: if single-buffer pipeline_mode is rejected by this
        # jax/Mosaic build, fall back to default double-buffered weights.
        out = _run(single_buffer_weights=False)

    if pad_b or pad_c:
        out = out[:B, :C]
    return out.reshape(orig_shape)


# ------------------------------- utilities ---------------------------------- #

def init_adapter_params(key, c_in, reduction=4, dtype=jnp.float32):
    """nn.Linear-style uniform init; weights returned as (in, out)."""
    hidden = c_in // reduction
    k1, k2 = jax.random.split(key)
    bound1 = 1.0 / math.sqrt(c_in)     # fan_in of first Linear
    bound2 = 1.0 / math.sqrt(hidden)   # fan_in of second Linear
    w1_t = jax.random.uniform(k1, (c_in, hidden), dtype, -bound1, bound1)
    w2_t = jax.random.uniform(k2, (hidden, c_in), dtype, -bound2, bound2)
    return w1_t, w2_t


def _reference(x, w1_t, w2_t):
    h = jnp.maximum(jnp.einsum('...c,ch->...h', x, w1_t), 0.0)
    return jnp.maximum(jnp.einsum('...h,hc->...c', h, w2_t), 0.0)


if __name__ == "__main__":
    key = jax.random.PRNGKey(0)
    kx, kx2, kp = jax.random.split(key, 3)

    batch, seq, c_in, reduction = 2, 8, 32, 4
    x = jax.random.normal(kx, (batch, seq, c_in), dtype=jnp.float32)
    w1_t, w2_t = init_adapter_params(kp, c_in, reduction)
    ref = _reference(x, w1_t, w2_t)

    # 1) default path: bf16 MXU operands, f32 accumulation, resident weights
    out = jax.block_until_ready(adapter_forward(x, w1_t, w2_t))
    assert out.shape == x.shape and out.dtype == x.dtype
    assert jnp.allclose(out, ref, atol=5e-2, rtol=5e-2)

    # 2) full f32 operands, 2-D input (tight tolerance)
    x2d = jax.random.normal(kx2, (8, c_in), dtype=jnp.float32)
    out2d = jax.block_until_ready(
        adapter_forward(x2d, w1_t, w2_t, compute_dtype=jnp.float32))
    assert out2d.shape == x2d.shape
    assert jnp.allclose(out2d, _reference(x2d, w1_t, w2_t), atol=1e-5, rtol=1e-5)

    # 3) forced weight-streaming path (exercises the v7x large-C fallback)
    out_wt = jax.block_until_ready(
        adapter_forward(x, w1_t, w2_t, compute_dtype=jnp.float32,
                        weight_tiling=True))
    assert out_wt.shape == x.shape
    assert jnp.allclose(out_wt, ref, atol=1e-5, rtol=1e-5)

    print("KERNEL_OK")
</pallas_src>

<mosaic_0001>
module attributes {stable_mosaic.version = 11 : i64} {
  func.func @adapter_kernel(%arg0: i32, %arg1: memref<8x128xbf16, #tpu.memory_space<vmem>>, %arg2: memref<128x128xbf16, #tpu.memory_space<vmem>>, %arg3: memref<128x128xbf16, #tpu.memory_space<vmem>>, %arg4: memref<8x128xf32, #tpu.memory_space<vmem>>) attributes {dimension_semantics = [#tpu.dimension_semantics<parallel>], iteration_bounds = array<i64: 2>, scalar_prefetch = 0 : i64, scratch_operands = 0 : i64, tpu.core_type = #tpu.core_type<tc>, window_params = [{transform_indices = @transform_0, window_bounds = array<i64: 8, 128>}, {pipeline_mode = #tpu.pipeline_mode<synchronous>, transform_indices = @transform_1, window_bounds = array<i64: 128, 128>}, {pipeline_mode = #tpu.pipeline_mode<synchronous>, transform_indices = @transform_2, window_bounds = array<i64: 128, 128>}, {transform_indices = @transform_3, window_bounds = array<i64: 8, 128>}]} {
    %c0 = arith.constant 0 : index
    %c0_0 = arith.constant 0 : index
    %0 = vector.load %arg1[%c0, %c0_0] : memref<8x128xbf16, #tpu.memory_space<vmem>>, vector<8x128xbf16>
    %c0_1 = arith.constant 0 : index
    %c0_2 = arith.constant 0 : index
    %1 = vector.load %arg2[%c0_1, %c0_2] : memref<128x128xbf16, #tpu.memory_space<vmem>>, vector<128x128xbf16>
    %cst = arith.constant dense<0.000000e+00> : vector<8x128xf32>
    %2 = tpu.matmul %0, %1, %cst {dimension_numbers = #tpu.dot_dimension_numbers<[1], [0], [0], [1], [0, 0, 1, 1], [], []>} : vector<8x128xbf16>, vector<128x128xbf16>, vector<8x128xf32> -> vector<8x128xf32>
    %cst_3 = arith.constant 0.000000e+00 : f32
    %3 = vector.broadcast %cst_3 : f32 to vector<8x128xf32>
    %4 = arith.maximumf %2, %3 : vector<8x128xf32>
    %5 = arith.truncf %4 : vector<8x128xf32> to vector<8x128xbf16>
    %c0_4 = arith.constant 0 : index
    %c0_5 = arith.constant 0 : index
    %6 = vector.load %arg3[%c0_4, %c0_5] : memref<128x128xbf16, #tpu.memory_space<vmem>>, vector<128x128xbf16>
    %cst_6 = arith.constant dense<0.000000e+00> : vector<8x128xf32>
    %7 = tpu.matmul %5, %6, %cst_6 {dimension_numbers = #tpu.dot_dimension_numbers<[1], [0], [0], [1], [0, 0, 1, 1], [], []>} : vector<8x128xbf16>, vector<128x128xbf16>, vector<8x128xf32> -> vector<8x128xf32>
    %cst_7 = arith.constant 0.000000e+00 : f32
    %8 = vector.broadcast %cst_7 : f32 to vector<8x128xf32>
    %9 = arith.maximumf %7, %8 : vector<8x128xf32>
    %c0_8 = arith.constant 0 : index
    %c0_9 = arith.constant 0 : index
    %10 = vector.load %arg4[%c0_8, %c0_9] : memref<8x128xf32, #tpu.memory_space<vmem>>, vector<8x128xf32>
    tpu.vector_store %arg4[%c0_8, %c0_9], %9 {strides = array<i32>} : memref<8x128xf32, #tpu.memory_space<vmem>>, vector<8x128xf32>,
    return
  }
  func.func @transform_0(%arg0: i32) -> (i32, i32) {
    %c0_i32 = arith.constant 0 : i32
    %c0_i32_0 = arith.constant 0 : i32
    return %arg0, %c0_i32 : i32, i32
  }
  func.func @transform_1(%arg0: i32) -> (i32, i32) {
    %c0_i32 = arith.constant 0 : i32
    %c0_i32_0 = arith.constant 0 : i32
    %c0_i32_1 = arith.constant 0 : i32
    return %c0_i32, %c0_i32_0 : i32, i32
  }
  func.func @transform_2(%arg0: i32) -> (i32, i32) {
    %c0_i32 = arith.constant 0 : i32
    %c0_i32_0 = arith.constant 0 : i32
    %c0_i32_1 = arith.constant 0 : i32
    return %c0_i32, %c0_i32_0 : i32, i32
  }
  func.func @transform_3(%arg0: i32) -> (i32, i32) {
    %c0_i32 = arith.constant 0 : i32
    %c0_i32_0 = arith.constant 0 : i32
    return %arg0, %c0_i32 : i32, i32
  }
}

module attributes {stable_mosaic.version = 11 : i64} {
  func.func @adapter_kernel(%arg0: i32, %arg1: memref<8x128xbf16, #tpu.memory_space<vmem>>, %arg2: memref<128x128xbf16, #tpu.memory_space<vmem>>, %arg3: memref<128x128xbf16, #tpu.memory_space<vmem>>, %arg4: memref<8x128xf32, #tpu.memory_space<vmem>>) attributes {dimension_semantics = [#tpu.dimension_semantics<parallel>], iteration_bounds = array<i64: 2>, scalar_prefetch = 0 : i64, scratch_operands = 0 : i64, tpu.core_type = #tpu.core_type<tc>, window_params = [{transform_indices = @transform_0, window_bounds = array<i64: 8, 128>}, {pipeline_mode = #tpu.pipeline_mode<synchronous>, transform_indices = @transform_1, window_bounds = array<i64: 128, 128>}, {pipeline_mode = #tpu.pipeline_mode<synchronous>, transform_indices = @transform_2, window_bounds = array<i64: 128, 128>}, {transform_indices = @transform_3, window_bounds = array<i64: 8, 128>}]} {
    %c0 = arith.constant 0 : index
    %c0_0 = arith.constant 0 : index
    %0 = vector.load %arg1[%c0, %c0_0] : memref<8x128xbf16, #tpu.memory_space<vmem>>, vector<8x128xbf16>
    %c0_1 = arith.constant 0 : index
    %c0_2 = arith.constant 0 : index
    %1 = vector.load %arg2[%c0_1, %c0_2] : memref<128x128xbf16, #tpu.memory_space<vmem>>, vector<128x128xbf16>
    %cst = arith.constant dense<0.000000e+00> : vector<8x128xf32>
    %2 = tpu.matmul %0, %1, %cst {dimension_numbers = #tpu.dot_dimension_numbers<[1], [0], [0], [1], [0, 0, 1, 1], [], []>} : vector<8x128xbf16>, vector<128x128xbf16>, vector<8x128xf32> -> vector<8x128xf32>
    %cst_3 = arith.constant 0.000000e+00 : f32
    %3 = vector.broadcast %cst_3 : f32 to vector<8x128xf32>
    %4 = arith.maximumf %2, %3 : vector<8x128xf32>
    %5 = arith.truncf %4 : vector<8x128xf32> to vector<8x128xbf16>
    %c0_4 = arith.constant 0 : index
    %c0_5 = arith.constant 0 : index
    %6 = vector.load %arg3[%c0_4, %c0_5] : memref<128x128xbf16, #tpu.memory_space<vmem>>, vector<128x128xbf16>
    %cst_6 = arith.constant dense<0.000000e+00> : vector<8x128xf32>
    %7 = tpu.matmul %5, %6, %cst_6 {dimension_numbers = #tpu.dot_dimension_numbers<[1], [0], [0], [1], [0, 0, 1, 1], [], []>} : vector<8x128xbf16>, vector<128x128xbf16>, vector<8x128xf32> -> vector<8x128xf32>
    %cst_7 = arith.constant 0.000000e+00 : f32
    %8 = vector.broadcast %cst_7 : f32 to vector<8x128xf32>
    %9 = arith.maximumf %7, %8 : vector<8x128xf32>
    %c0_8 = arith.constant 0 : index
    %c0_9 = arith.constant 0 : index
    %10 = vector.load %arg4[%c0_8, %c0_9] : memref<8x128xf32, #tpu.memory_space<vmem>>, vector<8x128xf32>
    tpu.vector_store %arg4[%c0_8, %c0_9], %9 {strides = array<i32>} : memref<8x128xf32, #tpu.memory_space<vmem>>, vector<8x128xf32>,
    return
  }
  func.func @transform_0(%arg0: i32) -> (i32, i32) {
    %c0_i32 = arith.constant 0 : i32
    %c0_i32_0 = arith.constant 0 : i32
    return %arg0, %c0_i32 : i32, i32
  }
  func.func @transform_1(%arg0: i32) -> (i32, i32) {
    %c0_i32 = arith.constant 0 : i32
    %c0_i32_0 = arith.constant 0 : i32
    %c0_i32_1 = arith.constant 0 : i32
    return %c0_i32, %c0_i32_0 : i32, i32
  }
  func.func @transform_2(%arg0: i32) -> (i32, i32) {
    %c0_i32 = arith.constant 0 : i32
    %c0_i32_0 = arith.constant 0 : i32
    %c0_i32_1 = arith.constant 0 : i32
    return %c0_i32, %c0_i32_0 : i32, i32
  }
  func.func @transform_3(%arg0: i32) -> (i32, i32) {
    %c0_i32 = arith.constant 0 : i32
    %c0_i32_0 = arith.constant 0 : i32
    return %arg0, %c0_i32 : i32, i32
  }
}

</mosaic_0001>

<bundles_post_ra>
// kernel: tpu_custom_call.1
= control target key start
LH: loop header
LB: loop body
LE: loop exit
PB: predicated region body
PF: predicated region fallthrough
CT: control target
= control target key end

     0   :  { %8 = vsyncpa [#allocation3], 0  ;;  %s1128_s0 = inlined_call_operand.hbm [shape: bf16[16,128], index: 0, kind: input, shape index: {}]   ;;  %s1129_s1 = inlined_call_operand.hbm [shape: bf16[128,128], index: 1, kind: input, shape index: {}]   ;;  %s1130_s2 = inlined_call_operand.hbm [shape: bf16[128,128], index: 2, kind: input, shape index: {}]   ;;  %s1131_s3 = inlined_call_operand.hbm [shape: f32[16,128], index: 3, kind: output, shape index: {}]  }
   0x1   :  { %10 = vsyncpa [#allocation3 + $0x1], 0 }
   0x2   :  { %11 = vsyncpa [#allocation6], 0 }
   0x3   :  { %12 = vsyncpa [#allocation4], 0 }
   0x4   :  { %14 = vsyncpa [#allocation4 + $0x1], 0  ;;  %s895_s12 = smov 0   ;;  %s897_s13 = smov 0  }
   0x5   :  { %s899_s14 = smov 0   ;;  %s901_s15 = smov 0  }
   0x6 LB: > { %s916_s16 = sadd.s32 4294967295, %s865_s15   ;;  %s532_s17 = sadd.s32 4294967294, %s865_s15   ;;  %s865_s15 = sphi %s901_s15, %s1151_s15   ;;  %s861_s14 = sphi %s899_s14, %s1150_s14   ;;  %s857_s13 = sphi %s897_s13, %s1149_s13   ;;  %s853_s12 = sphi %s895_s12, %s1148_s12  }
   0x7   : > { %p40_p0 = scmp.ne.s32.totalorder %s857_s13, %s853_s12  ;;  %p1132_p1 = scmp.eq.s32.totalorder %s916_s16, 0 }
   0x8   : > { %p112_p3 = scmp.eq.s32.totalorder %s532_s17, 1  ;;  %p533_p5 = scmp.ge.s32.totalorder %s865_s15, 1 }
   0x9   : > { %p925_p4 = por %p1132_p1, %p40_p0  ;;  %p119_p7 = scmp.lt.s32.totalorder %s865_s15, 3 }
   0xa   : > { %p930_p6 = por %p112_p3, %p40_p0  ;;  %s867_s21 = smov [#allocation5]  }
   0xb   : > { %s1135_s18 = scalar_select %p925_p4, 1, 0 }
   0xc   : > { %s1136_s19 = scalar_select %p930_p6, 1, 0 }
   0xd   : > { %p935_p8 = pnand %p533_p5, %p119_p7  ;;  %s131_s22 = sshll.u32 %s867_s21, 4  ;;  %s939_s22 = int_to_ptr.vmem [resolvable:$true] %s131_s22 }
   0xe   : > { %s868_s24 = smov [#allocation7]   ;;  %s709_s28 = scalar_lea.hbm %s1129_s1, 1024 }
   0xf   : > { %p634_p9 = pneg %p935_p8  ;;  %s144_s25 = sshll.u32 %s868_s24, 4  ;;  %s950_s25 = int_to_ptr.vmem [resolvable:$true] %s144_s25 }
  0x10   : > { %p710_p12 = scmp.ne.s32.totalorder %s1129_s1, %s709_s28  ;;  %p716_p5 = scmp.lt.u32.totalorder %s709_s28, %s1129_s1 }
  0x11   : > { %p946_p11 = pnand %p634_p9, %p1132_p1 }
  0x13   : > { %p711_p13 = pneg %p946_p11 }
  0x15   : > { %p712_p0 = pnand %p711_p13, %p710_p12 }
  0x17   : > { %p713_p3 = pneg %p712_p0 }
  0x19   : > { %p718_p7 = pnand %p716_p5, %p713_p3 }
  0x1b   : > { %721 = shalt.err (!%p718_p7)
}
  0x1c   : > { %s722_s6 = scalar_lea.vmem %s939_s22, 1024  ;;  %p730_p2 = scmp.lt.s32.totalorder %s939_s22, %s939_s22 }
  0x1d   : > { %p723_p9 = scmp.ne.s32.totalorder %s939_s22, %s722_s6  ;;  %p731_p12 = scmp.lt.s32.totalorder %s722_s6, %s722_s6 }
  0x1f   : > { %p725_p10 = pnand %p723_p9, %p711_p13  ;;  %p732_p0 = por %p731_p12, %p730_p2 }
  0x21   : > { %p726_p1 = pneg %p725_p10 }
  0x23   : > { %p733_p6 = pnand %p732_p0, %p726_p1 }
  0x25   : > { %736 = shalt.err (!%p733_p6)
}
  0x26   : > { %s869_s7 = smov 64   ;;  %s870_s8 = smov 4  }
  0x27   : > { %637 = dma.hbm_to_vmem [thread:$0]  (!%p946_p11), %s1129_s1, 1024, %s939_s22, [#allocation6], %s869_s7, %s869_s7, %s870_s8  }
  0x28   : > { %s737_s21 = scalar_lea.hbm %s1130_s2, 1024 }
  0x29   : > { %p738_p2 = scmp.ne.s32.totalorder %s1130_s2, %s737_s21  ;;  %p744_p10 = scmp.lt.u32.totalorder %s737_s21, %s1130_s2 }
  0x2b   : > { %p740_p1 = pnand %p738_p2, %p711_p13 }
  0x2d   : > { %p741_p6 = pneg %p740_p1 }
  0x2f   : > { %p746_p3 = pnand %p744_p10, %p741_p6 }
  0x31   : > { %749 = shalt.err (!%p746_p3)
}
  0x32   : > { %s750_s22 = scalar_lea.vmem %s950_s25, 1024  ;;  %p758_p12 = scmp.lt.s32.totalorder %s950_s25, %s950_s25 }
  0x33   : > { %p751_p5 = scmp.ne.s32.totalorder %s950_s25, %s750_s22  ;;  %p759_p0 = scmp.lt.s32.totalorder %s750_s22, %s750_s22 }
  0x35   : > { %p753_p7 = pnand %p751_p5, %p711_p13  ;;  %p760_p2 = por %p759_p0, %p758_p12 }
  0x37   : > { %p754_p9 = pneg %p753_p7 }
  0x39   : > { %p761_p1 = pnand %p760_p2, %p754_p9 }
  0x3b   : > { %764 = shalt.err (!%p761_p1)
}
  0x3c   : > { %640 = dma.hbm_to_vmem [thread:$0]  (!%p946_p11), %s1130_s2, 1024, %s950_s25, [#allocation6], %s869_s7, %s869_s7, %s870_s8  }
  0x3d   : > { %s1005_s4 = sadd.s32 1, %s865_s15   ;;  %s27_s23 = sadd.s32 1, %s861_s14 }
  0x3e   : > { %s24_s5 = ssub.s32 %s865_s15, %s1005_s4  ;;  %p34_p13 = scmp.ne.s32.totalorder %s861_s14, %s857_s13 }
  0x3f   : > { %p25_p6 = scmp.eq.s32.totalorder %s24_s5, 0  ;;  %p35_p10 = scmp.eq.s32.totalorder %s865_s15, 0 }
  0x40   : > { %p1139_p3 = scmp.eq.s32.totalorder %s916_s16, 1  ;;  %p651_p7 = scmp.lt.s32.totalorder %s865_s15, 2 }
  0x41   : > { %s1021_s9 = scalar_select %p25_p6, %s861_s14, %s27_s23  }
  0x42   : > { %p1015_p5 = por %p1139_p3, %p34_p13  ;;  %p36_p9 = por %p35_p10, %p34_p13 }
  0x43   : > { %s158_s10 = sand.u32 1, %s861_s14   ;;  %s538_s25 = sshll.u32 %s865_s15, 6 }
  0x44   : > { %s1140_s6 = scalar_select %p1015_p5, 1, 0 }
  0x45   : > { %s537_s11 = sshll.u32 %s158_s10, 2  ;;  %s1028_s17 = scalar_lea.hbm %s1128_s0, %s538_s25 }
  0x46   : > { %s162_s21 = scalar_lea.vmem [#allocation2], %s537_s11  ;;  %p1032_p11 = pnand %p651_p7, %p36_p9 }
  0x47   : > { %s169_s24 = sshll.u32 %s162_s21, 4  ;;  %s159_s27 = scalar_lea.sflag [#allocation3], %s158_s10  ;;  %s1030_s24 = int_to_ptr.vmem [resolvable:$true] %s169_s24 }
  0x48   : > { %s765_s28 = scalar_lea.hbm %s1028_s17, 64  ;;  %p767_p0 = pneg %p1032_p11 }
  0x49   : > { %p766_p12 = scmp.ne.s32.totalorder %s1028_s17, %s765_s28  ;;  %s770_s30 = scalar_lea.hbm %s1128_s0, 128 }
  0x4a   : > { %p771_p13 = scmp.lt.u32.totalorder %s1028_s17, %s1128_s0  ;;  %p772_p6 = scmp.lt.u32.totalorder %s770_s30, %s765_s28 }
  0x4b   : > { %p768_p2 = pnand %p767_p0, %p766_p12  ;;  %p774_p3 = scmp.lt.u32.totalorder %s765_s28, %s1028_s17 }
  0x4c   : > { %p773_p10 = por %p772_p6, %p771_p13 }
  0x4d   : > { %p769_p1 = pneg %p768_p2 }
  0x4e   : > { %p775_p7 = por %p774_p3, %p773_p10 }
  0x50   : > { %p776_p9 = pnand %p775_p7, %p769_p1 }
  0x52   : > { %779 = shalt.err (!%p776_p9)
}
  0x53   : > { %s780_s10 = scalar_lea.vmem %s1030_s24, 64  ;;  %s871_s11 = smov [#allocation2]  }
  0x54   : > { %p781_p12 = scmp.ne.s32.totalorder %s1030_s24, %s780_s10  ;;  %s785_s25 = sshll.u32 %s871_s11, 4  ;;  %s786_s25 = int_to_ptr.vmem [resolvable:$false] %s785_s25 }
  0x55   : > { %s787_s7 = scalar_lea.vmem %s786_s25, 128  ;;  %p788_p4 = scmp.lt.s32.totalorder %s1030_s24, %s786_s25 }
  0x56   : > { %p783_p2 = pnand %p781_p12, %p767_p0  ;;  %p789_p13 = scmp.lt.s32.totalorder %s787_s7, %s780_s10 }
  0x58   : > { %p784_p5 = pneg %p783_p2  ;;  %p790_p6 = por %p789_p13, %p788_p4 }
  0x5a   : > { %p791_p10 = pnand %p790_p6, %p784_p5 }
  0x5c   : > { %794 = shalt.err (!%p791_p10)
}
  0x5d   : > { %644 = dma.hbm_to_vmem [thread:$0]  (!%p1032_p11), %s1028_s17, 64, %s1030_s24, %s159_s27  }
  0x5e   : > { %178 = sbr.rel (%p935_p8) target bundleno = 583 (0x247), region = 32  ;;  %s1064_s8 = sand.u32 (!%p935_p8), 1, %s857_s13  }
  0x5f   : > { %s540_s21 = sshll.u32 (!%p935_p8), %s1064_s8, 2  ;;  %s181_s28 = scalar_lea.sflag (!%p935_p8), [#allocation3], %s1064_s8 }
  0x60   : > { %s1068_s22 = scalar_lea.vmem (!%p935_p8), [#allocation2], %s540_s21  ;;  %p1142_p4 = scmp.ne.s32.totalorder (!%p935_p8), %s1135_s18, 0 }
  0x65   : > { %840 = dma.done.wait (%p1142_p4), %s181_s28, 64  }
  0x66   : > { %842 = vsyncadd (%p1142_p4), %s181_s28, 4294967232  ;;  %p1143_p5 = scmp.eq.s32.totalorder %s916_s16, 0 }
  0x68   : > { %844 = dma.done.wait (%p1143_p5), [#allocation6], 2048   ;;  %p1144_p8 = pmov %p1143_p5 }
  0x69   : > { %v872_v0 = vmov 0.0   ;;  %vm873_vm0 = vmmov 0   ;;  %v693_v1 = vld [vmem:[#allocation5] sm:$0xff]   ;;  %v694_v2 = vld [vmem:[#allocation5 + $0x8] sm:$0xff]   ;;  %v695_v3 = vld [vmem:[#allocation5 + $0x10] sm:$0xff]   ;;  %s543_s18 = sshll.u32 %s1064_s8, 3 }
  0x6a   : > { %846 = vsyncadd (%p1144_p8), [#allocation6], 4294965248  ;;  %582 = vmatprep.subr.bf16.mxu0 %v872_v0  ;;  %598 = vmatprep.mubr.msk.bf16.mxu0 %vm873_vm0, %v872_v0  ;;  %v701_v4 = vld [vmem:[#allocation7] sm:$0xff]   ;;  %v696_v5 = vld [vmem:[#allocation5 + $0x18] sm:$0xff]   ;;  %s561_s20 = sshll.u32 %s916_s16, 7  ;;  %s214_s17 = scalar_lea.vmem [#allocation8], %s543_s18 }
  0x6b   : > { %602 = vmatprep.subr.bf16.mxu1 %v872_v0  ;;  %618 = vmatprep.mubr.msk.bf16.mxu1 %vm873_vm0, %v872_v0  ;;  %v702_v6 = vld [vmem:[#allocation7 + $0x8] sm:$0xff]   ;;  %v697_v7 = vld [vmem:[#allocation5 + $0x20] sm:$0xff]   ;;  %v703_v8 = vld [vmem:[#allocation7 + $0x10] sm:$0xff]   ;;  %s443_s24 = sshll.u32 %s214_s17, 4  ;;  %s1084_s29 = scalar_lea.hbm %s1131_s3, %s561_s20  ;;  %s1086_s24 = int_to_ptr.vmem [resolvable:$true] %s443_s24 }
  0x6c   : > { %583 = vmatpush3.bf16.msra.mxu0 %v693_v1  ;;  %603 = vmatpush3.bf16.msra.mxu1 %v701_v4  ;;  %v698_v9 = vld [vmem:[#allocation5 + $0x28] sm:$0xff]   ;;  %v704_v10 = vld [vmem:[#allocation7 + $0x18] sm:$0xff]   ;;  %v699_v11 = vld [vmem:[#allocation5 + $0x30] sm:$0xff]   ;;  %s430_s30 = scalar_lea.sflag [#allocation4], %s1064_s8  ;;  %s795_s16 = scalar_lea.vmem %s1086_s24, 128 }
  0x6d   : > { %584 = vmatprep.subr.bf16.mxu0 %v872_v0  ;;  %604 = vmatprep.subr.bf16.mxu1 %v872_v0  ;;  %v705_v12 = vld [vmem:[#allocation7 + $0x20] sm:$0xff]   ;;  %v700_v13 = vld [vmem:[#allocation5 + $0x38] sm:$0xff]   ;;  %v706_v14 = vld [vmem:[#allocation7 + $0x28] sm:$0xff]   ;;  %p796_p11 = scmp.ne.s32.totalorder %s1086_s24, %s795_s16  ;;  %p1145_p0 = scmp.ne.s32.totalorder %s1140_s6, 0 }
  0x6e   : > { %v216_v15 = vld [vmem:[%s1068_s22] sm:$0xf]  ;;  %v707_v16 = vld [vmem:[#allocation7 + $0x30] sm:$0xff]   ;;  %s874_s23 = smov [#allocation8]  }
  0x6f   : > { %v708_v17 = vld [vmem:[#allocation7 + $0x38] sm:$0xff]   ;;  %p797_p1 = pnand %p796_p11, %p1145_p0  ;;  %s799_s5 = sshll.u32 %s874_s23, 4  ;;  %s800_s5 = int_to_ptr.vmem [resolvable:$false] %s799_s5 }
  0x70   : > { %585 = vmatpush3.bf16.msra.mxu0 %v694_v2  ;;  %605 = vmatpush3.bf16.msra.mxu1 %v702_v6  ;;  %s801_s10 = scalar_lea.vmem %s800_s5, 256  ;;  %p802_p7 = scmp.lt.s32.totalorder %s1086_s24, %s800_s5 }
  0x71   : > { %586 = vmatprep.subr.bf16.mxu0 %v872_v0  ;;  %606 = vmatprep.subr.bf16.mxu1 %v872_v0  ;;  %p798_p3 = pneg %p797_p1  ;;  %p803_p9 = scmp.lt.s32.totalorder %s801_s10, %s795_s16 }
  0x73   : > { %p804_p12 = por %p803_p9, %p802_p7 }
  0x74   : > { %587 = vmatpush3.bf16.msra.mxu0 %v695_v3  ;;  %607 = vmatpush3.bf16.msra.mxu1 %v703_v8 }
  0x75   : > { %588 = vmatprep.subr.bf16.mxu0 %v872_v0  ;;  %608 = vmatprep.subr.bf16.mxu1 %v872_v0  ;;  %p805_p2 = pnand %p804_p12, %p798_p3 }
  0x78   : > { %589 = vmatpush3.bf16.msra.mxu0 %v696_v5  ;;  %609 = vmatpush3.bf16.msra.mxu1 %v704_v10 }
  0x79   : > { %590 = vmatprep.subr.bf16.mxu0 %v872_v0  ;;  %610 = vmatprep.subr.bf16.mxu1 %v872_v0 }
  0x7c   : > { %591 = vmatpush3.bf16.msra.mxu0 %v697_v7  ;;  %611 = vmatpush3.bf16.msra.mxu1 %v705_v12 }
  0x7d   : > { %592 = vmatprep.subr.bf16.mxu0 %v872_v0  ;;  %612 = vmatprep.subr.bf16.mxu1 %v872_v0 }
  0x80   : > { %593 = vmatpush3.bf16.msra.mxu0 %v698_v9  ;;  %613 = vmatpush3.bf16.msra.mxu1 %v706_v14 }
  0x81   : > { %594 = vmatprep.subr.bf16.mxu0 %v872_v0  ;;  %614 = vmatprep.subr.bf16.mxu1 %v872_v0 }
  0x84   : > { %595 = vmatpush3.bf16.msra.mxu0 %v699_v11  ;;  %615 = vmatpush3.bf16.msra.mxu1 %v707_v16 }
  0x85   : > { %596 = vmatprep.subr.bf16.mxu0 %v872_v0  ;;  %616 = vmatprep.subr.bf16.mxu1 %v872_v0 }
  0x88   : > { %597 = vmatpush3.bf16.msra.mxu0 %v700_v13  ;;  %617 = vmatpush3.bf16.msra.mxu1 %v708_v17 }
  0x8b   : > { %599 = vmatmul.mubr.bf16.vlgmr.msra.gmra.mrb[0].mxu0 %v216_v15 }
 0x15e   : > { %v315_v18 = vpop.f32.mrb[0].mxu0 }
 0x15f   : > { %v321_v19 = vmax.f32 %v315_v18, 0.0  ;;  %v600_v20 = vpop.f32.mrb[1].mxu0 }
 0x160   : > { %v318_v21 = vpop.f32.mrb[2].mxu0 }
 0x161   : > { %v322_v22 = vpack.c.bf16 %v321_v19, %v321_v19  ;;  %v601_v23 = vpop.f32.mrb[3].mxu0 }
 0x163   : > { %619 = vmatmul.mubr.bf16.vlgmr.msra.gmra.mrb[0].mxu1 %v322_v22 }
 0x236   : > { %v421_v24 = vpop.f32.mrb[0].mxu1 }
 0x237   : > { %v427_v25 = vmax.f32 %v421_v24, 0.0  ;;  %v620_v26 = vpop.f32.mrb[1].mxu1 }
 0x238   : > { %v424_v27 = vpop.f32.mrb[2].mxu1 }
 0x239   : > { %428 = vst [vmem:[%s214_s17] sm:$0xff] %v427_v25  ;;  %v621_v28 = vpop.f32.mrb[3].mxu1 }
 0x23a   : > { %808 = shalt.err (!%p805_p2)
}
 0x23b   : > { %s809_s11 = scalar_lea.hbm %s1084_s29, 128  ;;  %s813_s8 = scalar_lea.hbm %s1131_s3, 256 }
 0x23c   : > { %p810_p13 = scmp.ne.s32.totalorder %s1084_s29, %s809_s11  ;;  %p814_p4 = scmp.lt.u32.totalorder %s1084_s29, %s1131_s3 }
 0x23d   : > { %p815_p5 = scmp.lt.u32.totalorder %s813_s8, %s809_s11  ;;  %p817_p11 = scmp.lt.u32.totalorder %s809_s11, %s1084_s29 }
 0x23e   : > { %p811_p6 = pnand %p810_p13, %p1145_p0 }
 0x23f   : > { %p816_p8 = por %p815_p5, %p814_p4 }
 0x240   : > { %p812_p10 = pneg %p811_p6 }
 0x241   : > { %p818_p1 = por %p817_p11, %p816_p8 }
 0x243   : > { %p819_p3 = pnand %p818_p1, %p812_p10 }
 0x245   : > { %822 = shalt.err (!%p819_p3)
}
 0x246   : > { %632 = dma.vmem_to_hbm [thread:$0]  (%p1145_p0), %s1086_s24, 128, %s1084_s29, %s430_s30  }
 0x247 PF: > { %s455_s22 = sand.u32 1, %s853_s12   ;;  %p1146_p7 = scmp.ne.s32.totalorder %s1136_s19, 0 }
 0x248   : > { %p1147_p9 = scmp.ge.s32.totalorder %s865_s15, 2  ;;  %s456_s18 = scalar_lea.sflag [#allocation4], %s455_s22 }
 0x24a   : > { %p646_p12 = pnand %p1147_p9, %p1146_p7 }
 0x24c   : > { %848 = dma.done.wait (!%p646_p12), %s456_s18, 128  }
 0x24d   : > { %850 = vsyncadd (!%p646_p12), %s456_s18, 4294967168  ;;  %p17_p2 = scmp.ge.s32.totalorder %s1005_s4, 4   ;;  %s1148_s12 = smov %s857_s13 }
 0x24e   : > { %s1149_s13 = smov %s861_s14  ;;  %s1150_s14 = smov %s1021_s9 }
 0x24f   : > { %s1151_s15 = smov %s1005_s4  ;;  %19 = sbr.rel (!%p17_p2) target bundleno = 6 (0x6), region = 85 }
 0x256   :  { %461 = vsyncpa [#allocation3], 1 }
 0x257   :  { %463 = vsyncpa [#allocation3 + $0x1], 1 }
 0x258   :  { %464 = vsyncpa [#allocation6], 1 }
 0x259   :  { %465 = vsyncpa [#allocation4], 1 }
 0x25a   :  { %467 = vsyncpa [#allocation4 + $0x1], 1 }

// kernel: tpu_custom_call.1
= control target key start
LH: loop header
LB: loop body
LE: loop exit
PB: predicated region body
PF: predicated region fallthrough
CT: control target
= control target key end

     0   :  { %8 = vsyncpa [#allocation3], 0  ;;  %s1128_s0 = inlined_call_operand.hbm [shape: bf16[16,128], index: 0, kind: input, shape index: {}]   ;;  %s1129_s1 = inlined_call_operand.hbm [shape: bf16[128,128], index: 1, kind: input, shape index: {}]   ;;  %s1130_s2 = inlined_call_operand.hbm [shape: bf16[128,128], index: 2, kind: input, shape index: {}]   ;;  %s1131_s3 = inlined_call_operand.hbm [shape: f32[16,128], index: 3, kind: output, shape index: {}]  }
   0x1   :  { %10 = vsyncpa [#allocation3 + $0x1], 0 }
   0x2   :  { %11 = vsyncpa [#allocation6], 0 }
   0x3   :  { %12 = vsyncpa [#allocation4], 0 }
   0x4   :  { %14 = vsyncpa [#allocation4 + $0x1], 0  ;;  %s895_s12 = smov 0   ;;  %s897_s13 = smov 0  }
   0x5   :  { %s899_s14 = smov 0   ;;  %s901_s15 = smov 0  }
   0x6 LB: > { %s916_s16 = sadd.s32 4294967295, %s865_s15   ;;  %s532_s17 = sadd.s32 4294967294, %s865_s15   ;;  %s865_s15 = sphi %s901_s15, %s1151_s15   ;;  %s861_s14 = sphi %s899_s14, %s1150_s14   ;;  %s857_s13 = sphi %s897_s13, %s1149_s13   ;;  %s853_s12 = sphi %s895_s12, %s1148_s12  }
   0x7   : > { %p40_p0 = scmp.ne.s32.totalorder %s857_s13, %s853_s12  ;;  %p1132_p1 = scmp.eq.s32.totalorder %s916_s16, 0 }
   0x8   : > { %p112_p3 = scmp.eq.s32.totalorder %s532_s17, 1  ;;  %p533_p5 = scmp.ge.s32.totalorder %s865_s15, 1 }
   0x9   : > { %p925_p4 = por %p1132_p1, %p40_p0  ;;  %p119_p7 = scmp.lt.s32.totalorder %s865_s15, 3 }
   0xa   : > { %p930_p6 = por %p112_p3, %p40_p0  ;;  %s867_s21 = smov [#allocation5]  }
   0xb   : > { %s1135_s18 = scalar_select %p925_p4, 1, 0 }
   0xc   : > { %s1136_s19 = scalar_select %p930_p6, 1, 0 }
   0xd   : > { %p935_p8 = pnand %p533_p5, %p119_p7  ;;  %s131_s22 = sshll.u32 %s867_s21, 4  ;;  %s939_s22 = int_to_ptr.vmem [resolvable:$true] %s131_s22 }
   0xe   : > { %s868_s24 = smov [#allocation7]   ;;  %s709_s28 = scalar_lea.hbm %s1129_s1, 1024 }
   0xf   : > { %p634_p9 = pneg %p935_p8  ;;  %s144_s25 = sshll.u32 %s868_s24, 4  ;;  %s950_s25 = int_to_ptr.vmem [resolvable:$true] %s144_s25 }
  0x10   : > { %p710_p12 = scmp.ne.s32.totalorder %s1129_s1, %s709_s28  ;;  %p716_p5 = scmp.lt.u32.totalorder %s709_s28, %s1129_s1 }
  0x11   : > { %p946_p11 = pnand %p634_p9, %p1132_p1 }
  0x13   : > { %p711_p13 = pneg %p946_p11 }
  0x15   : > { %p712_p0 = pnand %p711_p13, %p710_p12 }
  0x17   : > { %p713_p3 = pneg %p712_p0 }
  0x19   : > { %p718_p7 = pnand %p716_p5, %p713_p3 }
  0x1b   : > { %721 = shalt.err (!%p718_p7)
}
  0x1c   : > { %s722_s6 = scalar_lea.vmem %s939_s22, 1024  ;;  %p730_p2 = scmp.lt.s32.totalorder %s939_s22, %s939_s22 }
  0x1d   : > { %p723_p9 = scmp.ne.s32.totalorder %s939_s22, %s722_s6  ;;  %p731_p12 = scmp.lt.s32.totalorder %s722_s6, %s722_s6 }
  0x1f   : > { %p725_p10 = pnand %p723_p9, %p711_p13  ;;  %p732_p0 = por %p731_p12, %p730_p2 }
  0x21   : > { %p726_p1 = pneg %p725_p10 }
  0x23   : > { %p733_p6 = pnand %p732_p0, %p726_p1 }
  0x25   : > { %736 = shalt.err (!%p733_p6)
}
  0x26   : > { %s869_s7 = smov 64   ;;  %s870_s8 = smov 4  }
  0x27   : > { %637 = dma.hbm_to_vmem [thread:$0]  (!%p946_p11), %s1129_s1, 1024, %s939_s22, [#allocation6], %s869_s7, %s869_s7, %s870_s8  }
  0x28   : > { %s737_s21 = scalar_lea.hbm %s1130_s2, 1024 }
  0x29   : > { %p738_p2 = scmp.ne.s32.totalorder %s1130_s2, %s737_s21  ;;  %p744_p10 = scmp.lt.u32.totalorder %s737_s21, %s1130_s2 }
  0x2b   : > { %p740_p1 = pnand %p738_p2, %p711_p13 }
  0x2d   : > { %p741_p6 = pneg %p740_p1 }
  0x2f   : > { %p746_p3 = pnand %p744_p10, %p741_p6 }
  0x31   : > { %749 = shalt.err (!%p746_p3)
}
  0x32   : > { %s750_s22 = scalar_lea.vmem %s950_s25, 1024  ;;  %p758_p12 = scmp.lt.s32.totalorder %s950_s25, %s950_s25 }
  0x33   : > { %p751_p5 = scmp.ne.s32.totalorder %s950_s25, %s750_s22  ;;  %p759_p0 = scmp.lt.s32.totalorder %s750_s22, %s750_s22 }
  0x35   : > { %p753_p7 = pnand %p751_p5, %p711_p13  ;;  %p760_p2 = por %p759_p0, %p758_p12 }
  0x37   : > { %p754_p9 = pneg %p753_p7 }
  0x39   : > { %p761_p1 = pnand %p760_p2, %p754_p9 }
  0x3b   : > { %764 = shalt.err (!%p761_p1)
}
  0x3c   : > { %640 = dma.hbm_to_vmem [thread:$0]  (!%p946_p11), %s1130_s2, 1024, %s950_s25, [#allocation6], %s869_s7, %s869_s7, %s870_s8  }
  0x3d   : > { %s1005_s4 = sadd.s32 1, %s865_s15   ;;  %s27_s23 = sadd.s32 1, %s861_s14 }
  0x3e   : > { %s24_s5 = ssub.s32 %s865_s15, %s1005_s4  ;;  %p34_p13 = scmp.ne.s32.totalorder %s861_s14, %s857_s13 }
  0x3f   : > { %p25_p6 = scmp.eq.s32.totalorder %s24_s5, 0  ;;  %p35_p10 = scmp.eq.s32.totalorder %s865_s15, 0 }
  0x40   : > { %p1139_p3 = scmp.eq.s32.totalorder %s916_s16, 1  ;;  %p651_p7 = scmp.lt.s32.totalorder %s865_s15, 2 }
  0x41   : > { %s1021_s9 = scalar_select %p25_p6, %s861_s14, %s27_s23  }
  0x42   : > { %p1015_p5 = por %p1139_p3, %p34_p13  ;;  %p36_p9 = por %p35_p10, %p34_p13 }
  0x43   : > { %s158_s10 = sand.u32 1, %s861_s14   ;;  %s538_s25 = sshll.u32 %s865_s15, 6 }
  0x44   : > { %s1140_s6 = scalar_select %p1015_p5, 1, 0 }
  0x45   : > { %s537_s11 = sshll.u32 %s158_s10, 2  ;;  %s1028_s17 = scalar_lea.hbm %s1128_s0, %s538_s25 }
  0x46   : > { %s162_s21 = scalar_lea.vmem [#allocation2], %s537_s11  ;;  %p1032_p11 = pnand %p651_p7, %p36_p9 }
  0x47   : > { %s169_s24 = sshll.u32 %s162_s21, 4  ;;  %s159_s27 = scalar_lea.sflag [#allocation3], %s158_s10  ;;  %s1030_s24 = int_to_ptr.vmem [resolvable:$true] %s169_s24 }
  0x48   : > { %s765_s28 = scalar_lea.hbm %s1028_s17, 64  ;;  %p767_p0 = pneg %p1032_p11 }
  0x49   : > { %p766_p12 = scmp.ne.s32.totalorder %s1028_s17, %s765_s28  ;;  %s770_s30 = scalar_lea.hbm %s1128_s0, 128 }
  0x4a   : > { %p771_p13 = scmp.lt.u32.totalorder %s1028_s17, %s1128_s0  ;;  %p772_p6 = scmp.lt.u32.totalorder %s770_s30, %s765_s28 }
  0x4b   : > { %p768_p2 = pnand %p767_p0, %p766_p12  ;;  %p774_p3 = scmp.lt.u32.totalorder %s765_s28, %s1028_s17 }
  0x4c   : > { %p773_p10 = por %p772_p6, %p771_p13 }
  0x4d   : > { %p769_p1 = pneg %p768_p2 }
  0x4e   : > { %p775_p7 = por %p774_p3, %p773_p10 }
  0x50   : > { %p776_p9 = pnand %p775_p7, %p769_p1 }
  0x52   : > { %779 = shalt.err (!%p776_p9)
}
  0x53   : > { %s780_s10 = scalar_lea.vmem %s1030_s24, 64  ;;  %s871_s11 = smov [#allocation2]  }
  0x54   : > { %p781_p12 = scmp.ne.s32.totalorder %s1030_s24, %s780_s10  ;;  %s785_s25 = sshll.u32 %s871_s11, 4  ;;  %s786_s25 = int_to_ptr.vmem [resolvable:$false] %s785_s25 }
  0x55   : > { %s787_s7 = scalar_lea.vmem %s786_s25, 128  ;;  %p788_p4 = scmp.lt.s32.totalorder %s1030_s24, %s786_s25 }
  0x56   : > { %p783_p2 = pnand %p781_p12, %p767_p0  ;;  %p789_p13 = scmp.lt.s32.totalorder %s787_s7, %s780_s10 }
  0x58   : > { %p784_p5 = pneg %p783_p2  ;;  %p790_p6 = por %p789_p13, %p788_p4 }
  0x5a   : > { %p791_p10 = pnand %p790_p6, %p784_p5 }
  0x5c   : > { %794 = shalt.err (!%p791_p10)
}
  0x5d   : > { %644 = dma.hbm_to_vmem [thread:$0]  (!%p1032_p11), %s1028_s17, 64, %s1030_s24, %s159_s27  }
  0x5e   : > { %178 = sbr.rel (%p935_p8) target bundleno = 583 (0x247), region = 32  ;;  %s1064_s8 = sand.u32 (!%p935_p8), 1, %s857_s13  }
  0x5f   : > { %s540_s21 = sshll.u32 (!%p935_p8), %s1064_s8, 2  ;;  %s181_s28 = scalar_lea.sflag (!%p935_p8), [#allocation3], %s1064_s8 }
  0x60   : > { %s1068_s22 = scalar_lea.vmem (!%p935_p8), [#allocation2], %s540_s21  ;;  %p1142_p4 = scmp.ne.s32.totalorder (!%p935_p8), %s1135_s18, 0 }
  0x65   : > { %840 = dma.done.wait (%p1142_p4), %s181_s28, 64  }
  0x66   : > { %842 = vsyncadd (%p1142_p4), %s181_s28, 4294967232  ;;  %p1143_p5 = scmp.eq.s32.totalorder %s916_s16, 0 }
  0x68   : > { %844 = dma.done.wait (%p1143_p5), [#allocation6], 2048   ;;  %p1144_p8 = pmov %p1143_p5 }
  0x69   : > { %v872_v0 = vmov 0.0   ;;  %vm873_vm0 = vmmov 0   ;;  %v693_v1 = vld [vmem:[#allocation5] sm:$0xff]   ;;  %v694_v2 = vld [vmem:[#allocation5 + $0x8] sm:$0xff]   ;;  %v695_v3 = vld [vmem:[#allocation5 + $0x10] sm:$0xff]   ;;  %s543_s18 = sshll.u32 %s1064_s8, 3 }
  0x6a   : > { %846 = vsyncadd (%p1144_p8), [#allocation6], 4294965248  ;;  %582 = vmatprep.subr.bf16.mxu0 %v872_v0  ;;  %598 = vmatprep.mubr.msk.bf16.mxu0 %vm873_vm0, %v872_v0  ;;  %v701_v4 = vld [vmem:[#allocation7] sm:$0xff]   ;;  %v696_v5 = vld [vmem:[#allocation5 + $0x18] sm:$0xff]   ;;  %s561_s20 = sshll.u32 %s916_s16, 7  ;;  %s214_s17 = scalar_lea.vmem [#allocation8], %s543_s18 }
  0x6b   : > { %602 = vmatprep.subr.bf16.mxu1 %v872_v0  ;;  %618 = vmatprep.mubr.msk.bf16.mxu1 %vm873_vm0, %v872_v0  ;;  %v702_v6 = vld [vmem:[#allocation7 + $0x8] sm:$0xff]   ;;  %v697_v7 = vld [vmem:[#allocation5 + $0x20] sm:$0xff]   ;;  %v703_v8 = vld [vmem:[#allocation7 + $0x10] sm:$0xff]   ;;  %s443_s24 = sshll.u32 %s214_s17, 4  ;;  %s1084_s29 = scalar_lea.hbm %s1131_s3, %s561_s20  ;;  %s1086_s24 = int_to_ptr.vmem [resolvable:$true] %s443_s24 }
  0x6c   : > { %583 = vmatpush3.bf16.msra.mxu0 %v693_v1  ;;  %603 = vmatpush3.bf16.msra.mxu1 %v701_v4  ;;  %v698_v9 = vld [vmem:[#allocation5 + $0x28] sm:$0xff]   ;;  %v704_v10 = vld [vmem:[#allocation7 + $0x18] sm:$0xff]   ;;  %v699_v11 = vld [vmem:[#allocation5 + $0x30] sm:$0xff]   ;;  %s430_s30 = scalar_lea.sflag [#allocation4], %s1064_s8  ;;  %s795_s16 = scalar_lea.vmem %s1086_s24, 128 }
  0x6d   : > { %584 = vmatprep.subr.bf16.mxu0 %v872_v0  ;;  %604 = vmatprep.subr.bf16.mxu1 %v872_v0  ;;  %v705_v12 = vld [vmem:[#allocation7 + $0x20] sm:$0xff]   ;;  %v700_v13 = vld [vmem:[#allocation5 + $0x38] sm:$0xff]   ;;  %v706_v14 = vld [vmem:[#allocation7 + $0x28] sm:$0xff]   ;;  %p796_p11 = scmp.ne.s32.totalorder %s1086_s24, %s795_s16  ;;  %p1145_p0 = scmp.ne.s32.totalorder %s1140_s6, 0 }
  0x6e   : > { %v216_v15 = vld [vmem:[%s1068_s22] sm:$0xf]  ;;  %v707_v16 = vld [vmem:[#allocation7 + $0x30] sm:$0xff]   ;;  %s874_s23 = smov [#allocation8]  }
  0x6f   : > { %v708_v17 = vld [vmem:[#allocation7 + $0x38] sm:$0xff]   ;;  %p797_p1 = pnand %p796_p11, %p1145_p0  ;;  %s799_s5 = sshll.u32 %s874_s23, 4  ;;  %s800_s5 = int_to_ptr.vmem [resolvable:$false] %s799_s5 }
  0x70   : > { %585 = vmatpush3.bf16.msra.mxu0 %v694_v2  ;;  %605 = vmatpush3.bf16.msra.mxu1 %v702_v6  ;;  %s801_s10 = scalar_lea.vmem %s800_s5, 256  ;;  %p802_p7 = scmp.lt.s32.totalorder %s1086_s24, %s800_s5 }
  0x71   : > { %586 = vmatprep.subr.bf16.mxu0 %v872_v0  ;;  %606 = vmatprep.subr.bf16.mxu1 %v872_v0  ;;  %p798_p3 = pneg %p797_p1  ;;  %p803_p9 = scmp.lt.s32.totalorder %s801_s10, %s795_s16 }
  0x73   : > { %p804_p12 = por %p803_p9, %p802_p7 }
  0x74   : > { %587 = vmatpush3.bf16.msra.mxu0 %v695_v3  ;;  %607 = vmatpush3.bf16.msra.mxu1 %v703_v8 }
  0x75   : > { %588 = vmatprep.subr.bf16.mxu0 %v872_v0  ;;  %608 = vmatprep.subr.bf16.mxu1 %v872_v0  ;;  %p805_p2 = pnand %p804_p12, %p798_p3 }
  0x78   : > { %589 = vmatpush3.bf16.msra.mxu0 %v696_v5  ;;  %609 = vmatpush3.bf16.msra.mxu1 %v704_v10 }
  0x79   : > { %590 = vmatprep.subr.bf16.mxu0 %v872_v0  ;;  %610 = vmatprep.subr.bf16.mxu1 %v872_v0 }
  0x7c   : > { %591 = vmatpush3.bf16.msra.mxu0 %v697_v7  ;;  %611 = vmatpush3.bf16.msra.mxu1 %v705_v12 }
  0x7d   : > { %592 = vmatprep.subr.bf16.mxu0 %v872_v0  ;;  %612 = vmatprep.subr.bf16.mxu1 %v872_v0 }
  0x80   : > { %593 = vmatpush3.bf16.msra.mxu0 %v698_v9  ;;  %613 = vmatpush3.bf16.msra.mxu1 %v706_v14 }
  0x81   : > { %594 = vmatprep.subr.bf16.mxu0 %v872_v0  ;;  %614 = vmatprep.subr.bf16.mxu1 %v872_v0 }
  0x84   : > { %595 = vmatpush3.bf16.msra.mxu0 %v699_v11  ;;  %615 = vmatpush3.bf16.msra.mxu1 %v707_v16 }
  0x85   : > { %596 = vmatprep.subr.bf16.mxu0 %v872_v0  ;;  %616 = vmatprep.subr.bf16.mxu1 %v872_v0 }
  0x88   : > { %597 = vmatpush3.bf16.msra.mxu0 %v700_v13  ;;  %617 = vmatpush3.bf16.msra.mxu1 %v708_v17 }
  0x8b   : > { %599 = vmatmul.mubr.bf16.vlgmr.msra.gmra.mrb[0].mxu0 %v216_v15 }
 0x15e   : > { %v315_v18 = vpop.f32.mrb[0].mxu0 }
 0x15f   : > { %v321_v19 = vmax.f32 %v315_v18, 0.0  ;;  %v600_v20 = vpop.f32.mrb[1].mxu0 }
 0x160   : > { %v318_v21 = vpop.f32.mrb[2].mxu0 }
 0x161   : > { %v322_v22 = vpack.c.bf16 %v321_v19, %v321_v19  ;;  %v601_v23 = vpop.f32.mrb[3].mxu0 }
 0x163   : > { %619 = vmatmul.mubr.bf16.vlgmr.msra.gmra.mrb[0].mxu1 %v322_v22 }
 0x236   : > { %v421_v24 = vpop.f32.mrb[0].mxu1 }
 0x237   : > { %v427_v25 = vmax.f32 %v421_v24, 0.0  ;;  %v620_v26 = vpop.f32.mrb[1].mxu1 }
 0x238   : > { %v424_v27 = vpop.f32.mrb[2].mxu1 }
 0x239   : > { %428 = vst [vmem:[%s214_s17] sm:$0xff] %v427_v25  ;;  %v621_v28 = vpop.f32.mrb[3].mxu1 }
 0x23a   : > { %808 = shalt.err (!%p805_p2)
}
 0x23b   : > { %s809_s11 = scalar_lea.hbm %s1084_s29, 128  ;;  %s813_s8 = scalar_lea.hbm %s1131_s3, 256 }
 0x23c   : > { %p810_p13 = scmp.ne.s32.totalorder %s1084_s29, %s809_s11  ;;  %p814_p4 = scmp.lt.u32.totalorder %s1084_s29, %s1131_s3 }
 0x23d   : > { %p815_p5 = scmp.lt.u32.totalorder %s813_s8, %s809_s11  ;;  %p817_p11 = scmp.lt.u32.totalorder %s809_s11, %s1084_s29 }
 0x23e   : > { %p811_p6 = pnand %p810_p13, %p1145_p0 }
 0x23f   : > { %p816_p8 = por %p815_p5, %p814_p4 }
 0x240   : > { %p812_p10 = pneg %p811_p6 }
 0x241   : > { %p818_p1 = por %p817_p11, %p816_p8 }
 0x243   : > { %p819_p3 = pnand %p818_p1, %p812_p10 }
 0x245   : > { %822 = shalt.err (!%p819_p3)
}
 0x246   : > { %632 = dma.vmem_to_hbm [thread:$0]  (%p1145_p0), %s1086_s24, 128, %s1084_s29, %s430_s30  }
 0x247 PF: > { %s455_s22 = sand.u32 1, %s853_s12   ;;  %p1146_p7 = scmp.ne.s32.totalorder %s1136_s19, 0 }
 0x248   : > { %p1147_p9 = scmp.ge.s32.totalorder %s865_s15, 2  ;;  %s456_s18 = scalar_lea.sflag [#allocation4], %s455_s22 }
 0x24a   : > { %p646_p12 = pnand %p1147_p9, %p1146_p7 }
 0x24c   : > { %848 = dma.done.wait (!%p646_p12), %s456_s18, 128  }
 0x24d   : > { %850 = vsyncadd (!%p646_p12), %s456_s18, 4294967168  ;;  %p17_p2 = scmp.ge.s32.totalorder %s1005_s4, 4   ;;  %s1148_s12 = smov %s857_s13 }
 0x24e   : > { %s1149_s13 = smov %s861_s14  ;;  %s1150_s14 = smov %s1021_s9 }
 0x24f   : > { %s1151_s15 = smov %s1005_s4  ;;  %19 = sbr.rel (!%p17_p2) target bundleno = 6 (0x6), region = 85 }
 0x256   :  { %461 = vsyncpa [#allocation3], 1 }
 0x257   :  { %463 = vsyncpa [#allocation3 + $0x1], 1 }
 0x258   :  { %464 = vsyncpa [#allocation6], 1 }
 0x259   :  { %465 = vsyncpa [#allocation4], 1 }
 0x25a   :  { %467 = vsyncpa [#allocation4 + $0x1], 1 }

</bundles_post_ra>
